<compile_context>
chip_gen: v7x
topology: tpu7x:2x2x1
jax: 0.10.0
libtpu: 0.0.40
codegen_flags: <defaults>
</compile_context>

<pallas_src>
import jax
import jax.numpy as jnp
from jax import lax
from jax.experimental import pallas as pl
from jax.experimental.pallas import tpu as pltpu


# ----------------------------------------------------------------------------
# Plain-JAX glue: NCHW convolutions (1x1 qkv projection + 3x3 depthwise).
# ----------------------------------------------------------------------------
def conv2d(x, w, b=None, *, padding=0, groups=1):
    out = lax.conv_general_dilated(
        x, w, window_strides=(1, 1),
        padding=[(padding, padding), (padding, padding)],
        dimension_numbers=("NCHW", "OIHW", "NCHW"),
        feature_group_count=groups)
    if b is not None:
        out = out + b.reshape(1, -1, 1, 1)
    return out


# ----------------------------------------------------------------------------
# Phase 1: per-batch gram accumulation over HW tiles + softmax + Wt fold.
#   grid = (B, T); T is the reduction axis ("arbitrary").
#   Outputs Wt = Wp @ softmax(mask(normalize-scaled gram))  (dim, dim) per batch.
# ----------------------------------------------------------------------------
def gram_fold_kernel(q_ref, k_ref, temp_ref, mask_ref, wp_ref, wt_ref,
                     g_acc, ssq_acc, ssk_acc):
    t = pl.program_id(1)

    @pl.when(t == 0)
    def _init():
        g_acc[...] = jnp.zeros_like(g_acc)
        ssq_acc[...] = jnp.zeros_like(ssq_acc)
        ssk_acc[...] = jnp.zeros_like(ssk_acc)

    q = q_ref[0, 0]                                    # (dim, tile) f32
    k = k_ref[0, 0]                                    # (dim, tile) f32

    # Sums of squares for the folded L2 normalisation (no qn/kn temporaries).
    ssq_acc[...] += jnp.sum(q * q, axis=-1, keepdims=True)
    ssk_acc[...] += jnp.sum(k * k, axis=-1, keepdims=True)

    # Full-dim gram q @ k^T (contract over pixels), bf16 MXU, f32 accumulate.
    g_acc[...] += lax.dot_general(
        q.astype(jnp.bfloat16), k.astype(jnp.bfloat16),
        dimension_numbers=(((1,), (1,)), ((), ())),
        preferred_element_type=jnp.float32)

    @pl.when(t == pl.num_programs(1) - 1)
    def _finalize():
        dim = g_acc.shape[0]
        # 1 / max(||.||, eps) with eps = 1e-12 (matches F.normalize).
        inv_q = lax.rsqrt(jnp.maximum(ssq_acc[...], 1e-24))      # (dim, 1)
        inv_k = lax.rsqrt(jnp.maximum(ssk_acc[...], 1e-24))      # (dim, 1)
        # Move inv_k onto the lane axis without an XLU transpose:
        rows = lax.broadcasted_iota(jnp.int32, (dim, dim), 0)
        cols = lax.broadcasted_iota(jnp.int32, (dim, dim), 1)
        eye = (rows == cols).astype(jnp.float32)
        inv_k_row = jnp.sum(inv_k * eye, axis=0, keepdims=True)  # (1, dim)

        # logits[i,j] = <q_i/||q_i||, k_j/||k_j||> * temperature[head(i)],
        # block-diagonal additive mask kills cross-head entries.
        logits = g_acc[...] * (inv_q * temp_ref[...]) * inv_k_row + mask_ref[...]
        m = jnp.max(logits, axis=-1, keepdims=True)
        e = jnp.exp(logits - m)
        attn = e * pl.reciprocal(jnp.sum(e, axis=-1, keepdims=True), approx=True)

        # Fold the block-diagonal attention into the project_out weight.
        wt = jnp.dot(wp_ref[...].astype(jnp.bfloat16), attn.astype(jnp.bfloat16),
                     preferred_element_type=jnp.float32)
        wt_ref[0] = wt.astype(wt_ref.dtype)


# ----------------------------------------------------------------------------
# Phase 2: stream v tiles through y = Wt @ v + b (fully parallel grid).
# ----------------------------------------------------------------------------
def apply_kernel(wt_ref, bias_ref, v_ref, out_ref):
    wt = wt_ref[0].astype(jnp.bfloat16)                # (dim, dim)
    v = v_ref[0, 0].astype(jnp.bfloat16)               # (dim, tile)
    y = jnp.dot(wt, v, preferred_element_type=jnp.float32)
    out_ref[0] = (y + bias_ref[...]).astype(out_ref.dtype)


def _pick_hw_tile(hw, max_tile=2048):
    """Largest multiple of 128 that divides hw (capped); full hw if not /128."""
    if hw % 128 != 0:
        return hw
    t = 128
    while hw % (t * 2) == 0 and t * 2 <= max_tile:
        t *= 2
    return t


# ----------------------------------------------------------------------------
# Full TransAttention forward: conv glue + two-phase Pallas kernels.
# ----------------------------------------------------------------------------
def trans_attention_forward(x, p, *, num_heads, hw_tile=None):
    B, dim, H, W = x.shape
    HW = H * W
    c_head = dim // num_heads

    # qkv = qkv_dwconv(qkv(x))  (NCHW glue)
    qkv = conv2d(x, p["qkv_w"], p["qkv_b"])
    qkv = conv2d(qkv, p["dw_w"], p["dw_b"], padding=1, groups=3 * dim)

    # Pure reshape -- chunk(3, dim=1) preserved, channel-major, lane dim = H*W.
    qkv_r = qkv.reshape(B, 3, dim, HW)

    if hw_tile is None:
        hw_tile = _pick_hw_tile(HW)
    assert HW % hw_tile == 0
    T = HW // hw_tile

    wp = p["proj_w"][:, :, 0, 0]                          # (dim, dim)
    bp = p["proj_b"].reshape(dim, 1)                      # (dim, 1)
    # Per-row temperature (head-major contiguous channels) and block-diag mask.
    temp_rows = jnp.repeat(p["temperature"].reshape(num_heads),
                           c_head).reshape(dim, 1).astype(jnp.float32)
    head_ids = jnp.arange(dim) // c_head
    mask = jnp.where(head_ids[:, None] == head_ids[None, :],
                     0.0, -1e30).astype(jnp.float32)

    # ---- Phase 1: gram + sums-of-squares over HW tiles, fold into Wt. ----
    wt = pl.pallas_call(
        gram_fold_kernel,
        out_shape=jax.ShapeDtypeStruct((B, dim, dim), jnp.float32),
        grid=(B, T),
        in_specs=[
            pl.BlockSpec((1, 1, dim, hw_tile), lambda b, t: (b, 0, 0, t)),  # q
            pl.BlockSpec((1, 1, dim, hw_tile), lambda b, t: (b, 1, 0, t)),  # k
            pl.BlockSpec((dim, 1), lambda b, t: (0, 0)),                    # temp rows
            pl.BlockSpec((dim, dim), lambda b, t: (0, 0)),                  # head mask
            pl.BlockSpec((dim, dim), lambda b, t: (0, 0)),                  # project_out W
        ],
        out_specs=pl.BlockSpec((1, dim, dim), lambda b, t: (b, 0, 0)),
        scratch_shapes=[pltpu.VMEM((dim, dim), jnp.float32),   # gram accumulator
                        pltpu.VMEM((dim, 1), jnp.float32),     # sum q^2
                        pltpu.VMEM((dim, 1), jnp.float32)],    # sum k^2
        compiler_params=pltpu.CompilerParams(
            dimension_semantics=("parallel", "arbitrary")),
        cost_estimate=pl.CostEstimate(
            flops=2 * B * dim * dim * HW,
            transcendentals=B * dim * (dim + 3),
            bytes_accessed=2 * B * dim * HW * 4 + B * dim * dim * 4),
    )(qkv_r, qkv_r, temp_rows, mask, wp)

    # ---- Phase 2: y = Wt @ v + b, streamed over lane-dense HW tiles. ----
    out = pl.pallas_call(
        apply_kernel,
        out_shape=jax.ShapeDtypeStruct((B, dim, HW), x.dtype),
        grid=(B, T),
        in_specs=[
            pl.BlockSpec((1, dim, dim), lambda b, t: (b, 0, 0)),            # Wt
            pl.BlockSpec((dim, 1), lambda b, t: (0, 0)),                    # bias
            pl.BlockSpec((1, 1, dim, hw_tile), lambda b, t: (b, 2, 0, t)),  # v
        ],
        out_specs=pl.BlockSpec((1, dim, hw_tile), lambda b, t: (b, 0, t)),
        compiler_params=pltpu.CompilerParams(
            dimension_semantics=("parallel", "parallel")),
        cost_estimate=pl.CostEstimate(
            flops=2 * B * dim * dim * HW,
            transcendentals=0,
            bytes_accessed=2 * B * dim * HW * 4 + B * dim * dim * 4),
    )(wt, bp, qkv_r)

    return out.reshape(B, dim, H, W)


# ----------------------------------------------------------------------------
# Pure-JAX reference (mirrors the PyTorch forward) for a correctness check.
# Note: conv1/conv2/dropout/act are defined in the module but unused in forward.
# ----------------------------------------------------------------------------
def reference_forward(x, p, *, num_heads):
    B, dim, H, W = x.shape
    HW = H * W
    ch = dim // num_heads

    qkv = conv2d(x, p["qkv_w"], p["qkv_b"])
    qkv = conv2d(qkv, p["dw_w"], p["dw_b"], padding=1, groups=3 * dim)
    q, k, v = jnp.split(qkv, 3, axis=1)
    q = q.reshape(B, num_heads, ch, HW)
    k = k.reshape(B, num_heads, ch, HW)
    v = v.reshape(B, num_heads, ch, HW)

    q = q / jnp.maximum(jnp.linalg.norm(q, axis=-1, keepdims=True), 1e-12)
    k = k / jnp.maximum(jnp.linalg.norm(k, axis=-1, keepdims=True), 1e-12)

    attn = jnp.einsum("bhcp,bhdp->bhcd", q, k) * p["temperature"][None]
    attn = jax.nn.softmax(attn, axis=-1)
    out = jnp.einsum("bhcd,bhdp->bhcp", attn, v).reshape(B, dim, H, W)
    out = conv2d(out, p["proj_w"], p["proj_b"])
    return out


# ----------------------------------------------------------------------------
# Deterministic parameter initialization (shapes per TransAttention.__init__).
# ----------------------------------------------------------------------------
def init_params(key, dim, num_heads):
    keys = iter(jax.random.split(key, 8))

    def u(shape, scale=0.3):
        return jax.random.uniform(next(keys), shape, jnp.float32, -scale, scale)

    p = {}
    p["qkv_w"], p["qkv_b"] = u((3 * dim, dim, 1, 1)), u((3 * dim,))
    p["dw_w"], p["dw_b"] = u((3 * dim, 1, 3, 3)), u((3 * dim,))   # depthwise 3x3
    p["proj_w"], p["proj_b"] = u((dim, dim, 1, 1)), u((dim,))
    p["temperature"] = jnp.ones((num_heads, 1, 1), jnp.float32)
    return p


if __name__ == "__main__":
    key = jax.random.PRNGKey(0)
    B, dim, H, W = 2, 8, 16, 16        # H*W = 256 -> lane-dense tiles
    num_heads = 2
    kx, kp = jax.random.split(key)
    x = jax.random.normal(kx, (B, dim, H, W), jnp.float32)
    params = init_params(kp, dim, num_heads)

    # hw_tile=128 forces T=2 so the tiled reduction path is actually exercised.
    out = jax.block_until_ready(
        trans_attention_forward(x, params, num_heads=num_heads, hw_tile=128))
    ref = jax.block_until_ready(
        reference_forward(x, params, num_heads=num_heads))

    rel_err = float(jnp.max(jnp.abs(out - ref)) / (jnp.max(jnp.abs(ref)) + 1e-6))
    assert out.shape == (B, dim, H, W)
    assert rel_err < 2e-2, f"mismatch vs reference: rel_err={rel_err}"

    print("KERNEL_OK")
</pallas_src>

<mosaic_0001>
module attributes {stable_mosaic.version = 11 : i64} {
  func.func @gram_fold_kernel(%arg0: i32, %arg1: i32, %arg2: memref<1x1x8x128xf32, #tpu.memory_space<vmem>>, %arg3: memref<1x1x8x128xf32, #tpu.memory_space<vmem>>, %arg4: memref<8x1xf32, #tpu.memory_space<vmem>>, %arg5: memref<8x8xf32, #tpu.memory_space<vmem>>, %arg6: memref<8x8xf32, #tpu.memory_space<vmem>>, %arg7: memref<1x8x8xf32, #tpu.memory_space<vmem>>, %arg8: memref<8x8xf32, #tpu.memory_space<vmem>>, %arg9: memref<8x1xf32, #tpu.memory_space<vmem>>, %arg10: memref<8x1xf32, #tpu.memory_space<vmem>>) attributes {dimension_semantics = [#tpu.dimension_semantics<parallel>, #tpu.dimension_semantics<arbitrary>], iteration_bounds = array<i64: 2, 2>, scalar_prefetch = 0 : i64, scratch_operands = 3 : i64, tpu.core_type = #tpu.core_type<tc>, window_params = [{transform_indices = @transform_0, window_bounds = array<i64: 1, 1, 8, 128>}, {transform_indices = @transform_1, window_bounds = array<i64: 1, 1, 8, 128>}, {pipeline_mode = #tpu.pipeline_mode<synchronous>, transform_indices = @transform_2, window_bounds = array<i64: 8, 1>}, {pipeline_mode = #tpu.pipeline_mode<synchronous>, transform_indices = @transform_3, window_bounds = array<i64: 8, 8>}, {pipeline_mode = #tpu.pipeline_mode<synchronous>, transform_indices = @transform_4, window_bounds = array<i64: 8, 8>}, {transform_indices = @transform_5, window_bounds = array<i64: 1, 8, 8>}]} {
    %c0_i32 = arith.constant 0 : i32
    %0 = arith.cmpi eq, %arg1, %c0_i32 : i32
    %1 = arith.extui %0 : i1 to i32
    %c0_i32_0 = arith.constant 0 : i32
    %2 = arith.cmpi ne, %1, %c0_i32_0 : i32
    scf.if %2 {
      %cst_23 = arith.constant 0.000000e+00 : f32
      %28 = vector.broadcast %cst_23 : f32 to vector<8x8xf32>
      %c0_24 = arith.constant 0 : index
      %c0_25 = arith.constant 0 : index
      %29 = vector.load %arg8[%c0_24, %c0_25] : memref<8x8xf32, #tpu.memory_space<vmem>>, vector<8x8xf32>
      tpu.vector_store %arg8[%c0_24, %c0_25], %28 {strides = array<i32>} : memref<8x8xf32, #tpu.memory_space<vmem>>, vector<8x8xf32>,
      %cst_26 = arith.constant 0.000000e+00 : f32
      %30 = vector.broadcast %cst_26 : f32 to vector<8x1xf32>
      %c0_27 = arith.constant 0 : index
      %c0_28 = arith.constant 0 : index
      %31 = vector.load %arg9[%c0_27, %c0_28] : memref<8x1xf32, #tpu.memory_space<vmem>>, vector<8x1xf32>
      tpu.vector_store %arg9[%c0_27, %c0_28], %30 {strides = array<i32>} : memref<8x1xf32, #tpu.memory_space<vmem>>, vector<8x1xf32>,
      %cst_29 = arith.constant 0.000000e+00 : f32
      %32 = vector.broadcast %cst_29 : f32 to vector<8x1xf32>
      %c0_30 = arith.constant 0 : index
      %c0_31 = arith.constant 0 : index
      %33 = vector.load %arg10[%c0_30, %c0_31] : memref<8x1xf32, #tpu.memory_space<vmem>>, vector<8x1xf32>
      tpu.vector_store %arg10[%c0_30, %c0_31], %32 {strides = array<i32>} : memref<8x1xf32, #tpu.memory_space<vmem>>, vector<8x1xf32>,
    } else {
    }
    %c0 = arith.constant 0 : index
    %c0_1 = arith.constant 0 : index
    %c0_2 = arith.constant 0 : index
    %c0_3 = arith.constant 0 : index
    %3 = vector.load %arg2[%c0, %c0_1, %c0_2, %c0_3] : memref<1x1x8x128xf32, #tpu.memory_space<vmem>>, vector<1x1x8x128xf32>
    %4 = vector.shape_cast %3 : vector<1x1x8x128xf32> to vector<8x128xf32>
    %c0_4 = arith.constant 0 : index
    %c0_5 = arith.constant 0 : index
    %c0_6 = arith.constant 0 : index
    %c0_7 = arith.constant 0 : index
    %5 = vector.load %arg3[%c0_4, %c0_5, %c0_6, %c0_7] : memref<1x1x8x128xf32, #tpu.memory_space<vmem>>, vector<1x1x8x128xf32>
    %6 = vector.shape_cast %5 : vector<1x1x8x128xf32> to vector<8x128xf32>
    %c0_8 = arith.constant 0 : index
    %c0_9 = arith.constant 0 : index
    %7 = vector.load %arg9[%c0_8, %c0_9] : memref<8x1xf32, #tpu.memory_space<vmem>>, vector<8x1xf32>
    %8 = arith.mulf %4, %4 : vector<8x128xf32>
    %cst = arith.constant dense<0.000000e+00> : vector<8xf32>
    %9 = vector.multi_reduction <add>, %8, %cst [1] : vector<8x128xf32> to vector<8xf32>
    %10 = vector.shape_cast %9 : vector<8xf32> to vector<8x1xf32>
    %11 = arith.addf %7, %10 : vector<8x1xf32>
    %c0_10 = arith.constant 0 : index
    %c0_11 = arith.constant 0 : index
    %12 = vector.load %arg9[%c0_10, %c0_11] : memref<8x1xf32, #tpu.memory_space<vmem>>, vector<8x1xf32>
    tpu.vector_store %arg9[%c0_10, %c0_11], %11 {strides = array<i32>} : memref<8x1xf32, #tpu.memory_space<vmem>>, vector<8x1xf32>,
    %c0_12 = arith.constant 0 : index
    %c0_13 = arith.constant 0 : index
    %13 = vector.load %arg10[%c0_12, %c0_13] : memref<8x1xf32, #tpu.memory_space<vmem>>, vector<8x1xf32>
    %14 = arith.mulf %6, %6 : vector<8x128xf32>
    %cst_14 = arith.constant dense<0.000000e+00> : vector<8xf32>
    %15 = vector.multi_reduction <add>, %14, %cst_14 [1] : vector<8x128xf32> to vector<8xf32>
    %16 = vector.shape_cast %15 : vector<8xf32> to vector<8x1xf32>
    %17 = arith.addf %13, %16 : vector<8x1xf32>
    %c0_15 = arith.constant 0 : index
    %c0_16 = arith.constant 0 : index
    %18 = vector.load %arg10[%c0_15, %c0_16] : memref<8x1xf32, #tpu.memory_space<vmem>>, vector<8x1xf32>
    tpu.vector_store %arg10[%c0_15, %c0_16], %17 {strides = array<i32>} : memref<8x1xf32, #tpu.memory_space<vmem>>, vector<8x1xf32>,
    %c0_17 = arith.constant 0 : index
    %c0_18 = arith.constant 0 : index
    %19 = vector.load %arg8[%c0_17, %c0_18] : memref<8x8xf32, #tpu.memory_space<vmem>>, vector<8x8xf32>
    %20 = arith.truncf %4 : vector<8x128xf32> to vector<8x128xbf16>
    %21 = arith.truncf %6 : vector<8x128xf32> to vector<8x128xbf16>
    %cst_19 = arith.constant dense<0.000000e+00> : vector<8x8xf32>
    %22 = tpu.matmul %20, %21, %cst_19 {dimension_numbers = #tpu.dot_dimension_numbers<[1], [1], [0], [0], [0, 0, 1, 0], [], []>} : vector<8x128xbf16>, vector<8x128xbf16>, vector<8x8xf32> -> vector<8x8xf32>
    %23 = arith.addf %19, %22 : vector<8x8xf32>
    %c0_20 = arith.constant 0 : index
    %c0_21 = arith.constant 0 : index
    %24 = vector.load %arg8[%c0_20, %c0_21] : memref<8x8xf32, #tpu.memory_space<vmem>>, vector<8x8xf32>
    tpu.vector_store %arg8[%c0_20, %c0_21], %23 {strides = array<i32>} : memref<8x8xf32, #tpu.memory_space<vmem>>, vector<8x8xf32>,
    %c1_i32 = arith.constant 1 : i32
    %25 = arith.cmpi eq, %arg1, %c1_i32 : i32
    %26 = arith.extui %25 : i1 to i32
    %c0_i32_22 = arith.constant 0 : i32
    %27 = arith.cmpi ne, %26, %c0_i32_22 : i32
    scf.if %27 {
      %c0_23 = arith.constant 0 : index
      %c0_24 = arith.constant 0 : index
      %28 = vector.load %arg9[%c0_23, %c0_24] : memref<8x1xf32, #tpu.memory_space<vmem>>, vector<8x1xf32>
      %cst_25 = arith.constant 1.000000e-24 : f32
      %29 = vector.broadcast %cst_25 : f32 to vector<8x1xf32>
      %30 = arith.maximumf %28, %29 : vector<8x1xf32>
      %31 = math.rsqrt %30 : vector<8x1xf32>
      %c0_26 = arith.constant 0 : index
      %c0_27 = arith.constant 0 : index
      %32 = vector.load %arg10[%c0_26, %c0_27] : memref<8x1xf32, #tpu.memory_space<vmem>>, vector<8x1xf32>
      %cst_28 = arith.constant 1.000000e-24 : f32
      %33 = vector.broadcast %cst_28 : f32 to vector<8x1xf32>
      %34 = arith.maximumf %32, %33 : vector<8x1xf32>
      %35 = math.rsqrt %34 : vector<8x1xf32>
      %36 = tpu.iota {dimensions = array<i32: 0>} : vector<8x8xi32>
      %37 = tpu.iota {dimensions = array<i32: 1>} : vector<8x8xi32>
      %38 = arith.cmpi eq, %36, %37 : vector<8x8xi32>
      %39 = arith.extui %38 : vector<8x8xi1> to vector<8x8xi32>
      %40 = arith.sitofp %39 : vector<8x8xi32> to vector<8x8xf32>
      %41 = vector.broadcast %35 : vector<8x1xf32> to vector<8x8xf32>
      %42 = arith.mulf %41, %40 : vector<8x8xf32>
      %cst_29 = arith.constant dense<0.000000e+00> : vector<8xf32>
      %43 = vector.multi_reduction <add>, %42, %cst_29 [0] : vector<8x8xf32> to vector<8xf32>
      %44 = vector.shape_cast %43 : vector<8xf32> to vector<1x8xf32>
      %c0_30 = arith.constant 0 : index
      %c0_31 = arith.constant 0 : index
      %45 = vector.load %arg8[%c0_30, %c0_31] : memref<8x8xf32, #tpu.memory_space<vmem>>, vector<8x8xf32>
      %c0_32 = arith.constant 0 : index
      %c0_33 = arith.constant 0 : index
      %46 = vector.load %arg4[%c0_32, %c0_33] : memref<8x1xf32, #tpu.memory_space<vmem>>, vector<8x1xf32>
      %47 = arith.mulf %31, %46 : vector<8x1xf32>
      %48 = vector.broadcast %47 : vector<8x1xf32> to vector<8x8xf32>
      %49 = arith.mulf %45, %48 : vector<8x8xf32>
      %50 = vector.broadcast %44 : vector<1x8xf32> to vector<8x8xf32>
      %51 = arith.mulf %49, %50 : vector<8x8xf32>
      %c0_34 = arith.constant 0 : index
      %c0_35 = arith.constant 0 : index
      %52 = vector.load %arg5[%c0_34, %c0_35] : memref<8x8xf32, #tpu.memory_space<vmem>>, vector<8x8xf32>
      %53 = arith.addf %51, %52 : vector<8x8xf32>
      %cst_36 = arith.constant dense<0xFF800000> : vector<8xf32>
      %54 = vector.multi_reduction <maximumf>, %53, %cst_36 [1] : vector<8x8xf32> to vector<8xf32>
      %55 = vector.shape_cast %54 : vector<8xf32> to vector<8x1xf32>
      %56 = vector.broadcast %55 : vector<8x1xf32> to vector<8x8xf32>
      %57 = arith.subf %53, %56 : vector<8x8xf32>
      %58 = math.exp %57 : vector<8x8xf32>
      %cst_37 = arith.constant dense<0.000000e+00> : vector<8xf32>
      %59 = vector.multi_reduction <add>, %58, %cst_37 [1] : vector<8x8xf32> to vector<8xf32>
      %60 = vector.shape_cast %59 : vector<8xf32> to vector<8x1xf32>
      %61 = tpu.reciprocal %60 {approx = true} : vector<8x1xf32> -> vector<8x1xf32>
      %62 = vector.broadcast %61 : vector<8x1xf32> to vector<8x8xf32>
      %63 = arith.mulf %58, %62 : vector<8x8xf32>
      %c0_38 = arith.constant 0 : index
      %c0_39 = arith.constant 0 : index
      %64 = vector.load %arg6[%c0_38, %c0_39] : memref<8x8xf32, #tpu.memory_space<vmem>>, vector<8x8xf32>
      %65 = arith.truncf %64 : vector<8x8xf32> to vector<8x8xbf16>
      %66 = arith.truncf %63 : vector<8x8xf32> to vector<8x8xbf16>
      %cst_40 = arith.constant dense<0.000000e+00> : vector<8x8xf32>
      %67 = tpu.matmul %65, %66, %cst_40 {dimension_numbers = #tpu.dot_dimension_numbers<[1], [0], [0], [1], [0, 0, 1, 1], [], []>} : vector<8x8xbf16>, vector<8x8xbf16>, vector<8x8xf32> -> vector<8x8xf32>
      %c0_41 = arith.constant 0 : index
      %c0_42 = arith.constant 0 : index
      %c0_43 = arith.constant 0 : index
      %68 = vector.load %arg7[%c0_41, %c0_42, %c0_43] : memref<1x8x8xf32, #tpu.memory_space<vmem>>, vector<1x8x8xf32>
      %69 = vector.shape_cast %68 : vector<1x8x8xf32> to vector<8x8xf32>
      %70 = vector.shape_cast %67 : vector<8x8xf32> to vector<1x8x8xf32>
      tpu.vector_store %arg7[%c0_41, %c0_42, %c0_43], %70 {strides = array<i32>} : memref<1x8x8xf32, #tpu.memory_space<vmem>>, vector<1x8x8xf32>,
    } else {
    }
    return
  }
  func.func @transform_0(%arg0: i32, %arg1: i32) -> (i32, i32, i32, i32) {
    %c0_i32 = arith.constant 0 : i32
    %c0_i32_0 = arith.constant 0 : i32
    %c0_i32_1 = arith.constant 0 : i32
    return %arg0, %c0_i32, %c0_i32_0, %arg1 : i32, i32, i32, i32
  }
  func.func @transform_1(%arg0: i32, %arg1: i32) -> (i32, i32, i32, i32) {
    %c1_i32 = arith.constant 1 : i32
    %c0_i32 = arith.constant 0 : i32
    %c0_i32_0 = arith.constant 0 : i32
    return %arg0, %c1_i32, %c0_i32, %arg1 : i32, i32, i32, i32
  }
  func.func @transform_2(%arg0: i32, %arg1: i32) -> (i32, i32) {
    %c0_i32 = arith.constant 0 : i32
    %c0_i32_0 = arith.constant 0 : i32
    %c0_i32_1 = arith.constant 0 : i32
    return %c0_i32, %c0_i32_0 : i32, i32
  }
  func.func @transform_3(%arg0: i32, %arg1: i32) -> (i32, i32) {
    %c0_i32 = arith.constant 0 : i32
    %c0_i32_0 = arith.constant 0 : i32
    %c0_i32_1 = arith.constant 0 : i32
    return %c0_i32, %c0_i32_0 : i32, i32
  }
  func.func @transform_4(%arg0: i32, %arg1: i32) -> (i32, i32) {
    %c0_i32 = arith.constant 0 : i32
    %c0_i32_0 = arith.constant 0 : i32
    %c0_i32_1 = arith.constant 0 : i32
    return %c0_i32, %c0_i32_0 : i32, i32
  }
  func.func @transform_5(%arg0: i32, %arg1: i32) -> (i32, i32, i32) {
    %c0_i32 = arith.constant 0 : i32
    %c0_i32_0 = arith.constant 0 : i32
    %c0_i32_1 = arith.constant 0 : i32
    return %arg0, %c0_i32, %c0_i32_0 : i32, i32, i32
  }
}

</mosaic_0001>

<bundles_post_ra>
// kernel: tpu_custom_call.1
= control target key start
LH: loop header
LB: loop body
LE: loop exit
PB: predicated region body
PF: predicated region fallthrough
CT: control target
= control target key end

     0   :  { %s1270_s0 = inlined_call_operand.hbm [shape: f32[2,3,8,256], index: 0, kind: input, shape index: {}]   ;;  %s1271_s1 = inlined_call_operand.hbm [shape: f32[2,3,8,256], index: 1, kind: input, shape index: {}]   ;;  %s1272_s2 = inlined_call_operand.vmem [shape: f32[8,1], index: 2, kind: input, shape index: {}]   ;;  %s1273_s3 = inlined_call_operand.vmem [shape: f32[8,8], index: 3, kind: input, shape index: {}]   ;;  %s1274_s4 = inlined_call_operand.vmem [shape: f32[8,8], index: 4, kind: input, shape index: {}]   ;;  %s1275_s5 = inlined_call_operand.hbm [shape: f32[2,8,8], index: 5, kind: output, shape index: {}]  }
   0x1   :  { %1285 = sst [smem:[#allocation20_spill]] %s1270_s0 }
   0x2   :  { %10 = vsyncpa [#allocation6], 0 }
   0x3   :  { %12 = vsyncpa [#allocation6 + $0x1], 0 }
   0x4   :  { %13 = vsyncpa [#allocation9], 0 }
   0x5   :  { %15 = vsyncpa [#allocation9 + $0x1], 0 }
   0x6   :  { %16 = vsyncpa [#allocation7], 0 }
   0x7   :  { %18 = vsyncpa [#allocation7 + $0x1], 0  ;;  %s983_s18 = smov 0   ;;  %s985_s19 = smov 0  }
   0x8   :  { %s987_s20 = smov 0   ;;  %s989_s21 = smov 0  }
   0x9   :  { %s991_s22 = smov 0   ;;  %s993_s23 = smov 0  }
   0xa   :  { %s995_s24 = smov 0   ;;  %s997_s25 = smov 0  }
   0xb   :  { %s999_s26 = smov 0   ;;  %s1001_s27 = smov 0  }
   0xc   :  { %s1003_s28 = smov 0  }
   0xd LB: > { %1286 = sst [smem:[#allocation14_spill]] %s922_s23  ;;  %s596_s29 = sadd.s32 4294967295, %s942_s28   ;;  %s942_s28 = sphi %s1003_s28, %s24_s28   ;;  %s938_s27 = sphi %s1001_s27, %s1311_s27   ;;  %s934_s26 = sphi %s999_s26, %s1310_s26   ;;  %s930_s25 = sphi %s997_s25, %s1309_s25   ;;  %s926_s24 = sphi %s995_s24, %s1308_s24   ;;  %s922_s23 = sphi %s993_s23, %s1307_s23   ;;  %s918_s22 = sphi %s991_s22, %s1316_s22   ;;  %s914_s21 = sphi %s989_s21, %s1315_s21   ;;  %s910_s20 = sphi %s987_s20, %s1314_s20   ;;  %s906_s19 = sphi %s985_s19, %s1313_s19   ;;  %s902_s18 = sphi %s983_s18, %s1312_s18  }
   0xe   : > { %1287 = sst [smem:[#allocation15_spill]] %s934_s26  ;;  %s597_s30 = sadd.s32 4294967294, %s942_s28  }
   0xf   : > { %1288 = sst [smem:[#allocation16_spill]] %s938_s27  ;;  %s33_s6 = sadd.s32 1, %s934_s26 }
  0x10   : > { %s36_s7 = sadd.s32 1, %s938_s27  ;;  %p34_p0 = scmp.ge.s32.totalorder %s33_s6, 2 }
  0x11   : > { %s45_s8 = sadd.s32 1, %s922_s23  ;;  %p52_p1 = scmp.ne.s32.totalorder %s922_s23, %s918_s22 }
  0x12   : > { %p53_p2 = scmp.eq.s32.totalorder %s942_s28, 0  ;;  %s1318_s6 = smov (%p34_p0, %s33_s6), 0 }
  0x13   : > { %1289 = sst [smem:[#allocation17_spill]] %s1318_s6  ;;  %s1320_s7 = smov (!%p34_p0, %s36_s7), %s938_s27 }
  0x14   : > { %s41_s9 = ssub.s32 %s934_s26, %s1318_s6  ;;  %p1049_p3 = por %p53_p2, %p52_p1 }
  0x15   : > { %p38_p4 = scmp.ge.s32.totalorder %s1320_s7, 2  ;;  %p58_p5 = scmp.ne.s32.totalorder %s918_s22, %s914_s21 }
  0x16   : > { %p59_p6 = scmp.eq.s32.totalorder %s596_s29, 0  ;;  %s162_s11 = sadd.s32 1, %s910_s20 }
  0x17   : > { %s1322_s7 = smov (%p38_p4, %s1320_s7), 0  ;;  %p172_p8 = scmp.ne.s32.totalorder %s910_s20, %s906_s19 }
  0x18   : > { %1291 = sst [smem:[#allocation18_spill]] %s1322_s7  ;;  %p1057_p7 = por %p59_p6, %p58_p5 }
  0x19   : > { %s40_s13 = ssub.s32 %s938_s27, %s1322_s7  ;;  %p173_p9 = scmp.eq.s32.totalorder %s596_s29, 3 }
  0x1a   : > { %s1292_s12 = scalar_select %p1057_p7, 1, 0 }
  0x1b   : > { %s42_s14 = sor.u32 %s41_s9, %s40_s13  ;;  %p160_p10 = scmp.eq.s32.totalorder %s40_s13, 0 }
  0x1c   : > { %p43_p11 = scmp.eq.s32.totalorder %s42_s14, 0  ;;  %p1065_p12 = por %p173_p9, %p172_p8 }
  0x1d   : > { %s1070_s16 = scalar_select %p160_p10, %s910_s20, %s162_s11  }
  0x1e   : > { %s1293_s15 = scalar_select %p1065_p12, 1, 0 }
  0x1f   : > { %s1073_s17 = scalar_select %p43_p11, %s922_s23, %s45_s8  }
  0x20   : > { %p178_p13 = scmp.ne.s32.totalorder %s906_s19, %s902_s18  ;;  %p179_p0 = scmp.eq.s32.totalorder %s597_s30, 3 }
  0x21   : > { %1294 = sst [smem:[#allocation19_spill]] %s1073_s17  ;;  %p650_p1 = scmp.lt.s32.totalorder %s942_s28, 4 }
  0x22   : > { %p1078_p2 = por %p179_p0, %p178_p13  ;;  %s1083_s29 = sand.u32 1, %s922_s23  }
  0x23   : > { %s1279_s9 = sshll.u32 %s1083_s29, 3  ;;  %s632_s13 = smul.u32 6, %s938_s27 }
  0x24   : > { %s1295_s21 = scalar_select %p1078_p2, 1, 0 }
  0x25   : > { %s212_s11 = scalar_lea.vmem [#allocation5], %s1279_s9  ;;  %p1091_p4 = pnand %p650_p1, %p1049_p3 }
  0x26   : > { %s221_s14 = sshll.u32 %s212_s11, 4  ;;  %s1096_s30 = sadd.s32 %s934_s26, %s632_s13  ;;  %s1098_s14 = int_to_ptr.vmem [resolvable:$true] %s221_s14 }
  0x27   : > { %s1281_s7 = sshll.u32 %s1096_s30, 7  ;;  %s1297_s0 = sld [smem:[#allocation20_spill]] }
  0x28   : > { %s209_s10 = scalar_lea.sflag [#allocation6], %s1083_s29  ;;  %p757_p6 = pneg %p1091_p4 }
  0x2d   : > { %s1106_s9 = scalar_lea.hbm %s1297_s0, %s1281_s7  ;;  %s760_s27 = scalar_lea.hbm %s1297_s0, 1536 }
  0x2e   : > { %s755_s11 = scalar_lea.hbm %s1106_s9, 128  ;;  %p761_p10 = scmp.lt.u32.totalorder %s1106_s9, %s1297_s0 }
  0x2f   : > { %p756_p5 = scmp.ne.s32.totalorder %s1106_s9, %s755_s11  ;;  %p762_p11 = scmp.lt.u32.totalorder %s760_s27, %s755_s11 }
  0x30   : > { %p764_p0 = scmp.lt.u32.totalorder %s755_s11, %s1106_s9 }
  0x31   : > { %p758_p8 = pnand %p757_p6, %p756_p5  ;;  %p763_p13 = por %p762_p11, %p761_p10 }
  0x33   : > { %p759_p9 = pneg %p758_p8  ;;  %p765_p1 = por %p764_p0, %p763_p13 }
  0x35   : > { %p766_p3 = pnand %p765_p1, %p759_p9 }
  0x37   : > { %769 = shalt.err (!%p766_p3)
}
  0x38   : > { %s770_s17 = scalar_lea.vmem %s1098_s14, 128  ;;  %s944_s26 = smov [#allocation5]  }
  0x39   : > { %p771_p5 = scmp.ne.s32.totalorder %s1098_s14, %s770_s17  ;;  %s775_s13 = sshll.u32 %s944_s26, 4  ;;  %s776_s13 = int_to_ptr.vmem [resolvable:$false] %s775_s13 }
  0x3a   : > { %s777_s7 = scalar_lea.vmem %s776_s13, 256  ;;  %p778_p12 = scmp.lt.s32.totalorder %s1098_s14, %s776_s13 }
  0x3b   : > { %p773_p8 = pnand %p771_p5, %p757_p6  ;;  %p779_p10 = scmp.lt.s32.totalorder %s777_s7, %s770_s17 }
  0x3d   : > { %p774_p2 = pneg %p773_p8  ;;  %p780_p11 = por %p779_p10, %p778_p12 }
  0x3f   : > { %p781_p13 = pnand %p780_p11, %p774_p2 }
  0x41   : > { %784 = shalt.err (!%p781_p13)
}
  0x42   : > { %642 = dma.hbm_to_vmem [thread:$0]  (!%p1091_p4), %s1106_s9, 128, %s1098_s14, %s209_s10  }
  0x43   : > { %p247_p3 = scmp.lt.s32.totalorder %s942_s28, 5  ;;  %s1298_s11 = sshll.u32 %s1096_s30, 7 }
  0x44   : > { %s527_s17 = scalar_lea.hbm %s1271_s1, %s1298_s11  ;;  %p1299_p12 = scmp.ge.s32.totalorder %s942_s28, 1 }
  0x45   : > { %s1147_s13 = scalar_lea.hbm %s527_s17, 256  ;;  %s1301_s7 = sshll.u32 %s1083_s29, 3 }
  0x46   : > { %p1143_p2 = pnand %p1299_p12, %p247_p3  ;;  %s232_s0 = scalar_lea.vmem [#allocation8], %s1301_s7 }
  0x47   : > { %s242_s23 = sshll.u32 %s232_s0, 4  ;;  %s229_s9 = scalar_lea.sflag [#allocation9], %s1083_s29  ;;  %s243_s23 = int_to_ptr.vmem [resolvable:$true] %s242_s23 }
  0x48   : > { %s1300_s26 = scalar_select %p1143_p2, 1, 0 }
  0x49   : > { %s815_s14 = scalar_lea.hbm %s527_s17, 384  ;;  %s790_s11 = scalar_lea.hbm %s1271_s1, 1536 }
  0x4a   : > { %p786_p9 = scmp.ne.s32.totalorder %s1147_s13, %s815_s14  ;;  %p791_p5 = scmp.lt.u32.totalorder %s1147_s13, %s1271_s1 }
  0x4b   : > { %p792_p8 = scmp.lt.u32.totalorder %s790_s11, %s815_s14  ;;  %p794_p11 = scmp.lt.u32.totalorder %s815_s14, %s1147_s13 }
  0x4c   : > { %p788_p0 = pnand %p786_p9, %p757_p6 }
  0x4d   : > { %p793_p10 = por %p792_p8, %p791_p5 }
  0x4e   : > { %p789_p1 = pneg %p788_p0 }
  0x4f   : > { %p795_p13 = por %p794_p11, %p793_p10 }
  0x51   : > { %p796_p3 = pnand %p795_p13, %p789_p1 }
  0x53   : > { %799 = shalt.err (!%p796_p3)
}
  0x54   : > { %s800_s0 = scalar_lea.vmem %s243_s23, 128  ;;  %s945_s29 = smov [#allocation8]  }
  0x55   : > { %p801_p12 = scmp.ne.s32.totalorder %s243_s23, %s800_s0  ;;  %s805_s17 = sshll.u32 %s945_s29, 4  ;;  %s806_s17 = int_to_ptr.vmem [resolvable:$false] %s805_s17 }
  0x56   : > { %s807_s7 = scalar_lea.vmem %s806_s17, 256  ;;  %p808_p7 = scmp.lt.s32.totalorder %s243_s23, %s806_s17 }
  0x57   : > { %p803_p9 = pnand %p801_p12, %p757_p6  ;;  %p809_p2 = scmp.lt.s32.totalorder %s807_s7, %s800_s0 }
  0x59   : > { %p804_p0 = pneg %p803_p9  ;;  %p810_p5 = por %p809_p2, %p808_p7 }
  0x5b   : > { %p811_p8 = pnand %p810_p5, %p804_p0 }
  0x5d   : > { %814 = shalt.err (!%p811_p8)
}
  0x5e   : > { %645 = dma.hbm_to_vmem [thread:$0]  (!%p1091_p4), %s1147_s13, 128, %s243_s23, %s229_s9  }
  0x5f   : > { %p1302_p1 = scmp.ne.s32.totalorder %s1300_s26, 0 }
  0x60   : > { %s253_s14 = sand.u32 (!%p1302_p1), 1, %s918_s22   ;;  %p1303_p6 = scmp.ne.s32.totalorder (!%p1302_p1), %s1292_s12, 0 }
  0x61   : > { %251 = sbr.rel (%p1302_p1) target bundleno = 995 (0x3e3), region = 40  ;;  %s605_s30 = sshll.u32 (!%p1302_p1), %s253_s14, 3 }
  0x62   : > { %s254_s10 = scalar_lea.sflag (!%p1302_p1), [#allocation6], %s253_s14  ;;  %s257_s11 = scalar_lea.vmem (!%p1302_p1), [#allocation5], %s605_s30 }
  0x68   : > { %889 = dma.done.wait (%p1303_p6), %s254_s10, 128  }
  0x69   : > { %891 = vsyncadd (%p1303_p6), %s254_s10, 4294967168  ;;  %s263_s27 = scalar_lea.sflag [#allocation9], %s253_s14  ;;  %s266_s6 = scalar_lea.vmem [#allocation8], %s605_s30 }
  0x6a   : > { %893 = dma.done.wait (%p1303_p6), %s263_s27, 128  }
  0x6b   : > { %895 = vsyncadd (%p1303_p6), %s263_s27, 4294967168  ;;  %s295_s23 = sand.u32 1, %s906_s19   ;;  %p608_p7 = scmp.ne.s32.totalorder %s926_s24, 0 }
  0x6c   : > { %s1184_s8 = sshll.u32 %s295_s23, 3  ;;  %vm303_vm0 = vcmask (!%p608_p7), 64512   ;;  %vm305_vm1 = vcmask (!%p608_p7), 7168   ;;  %v946_v0 = vmov (!%p608_p7), 0.0  }
  0x6d   : > { %s297_s26 = scalar_lea.vmem [#allocation10], %s1184_s8  ;;  %302 = sbr.rel (%p608_p7) target bundleno = 116 (0x74), region = 52  ;;  %304 = vst.msk [vmem:[#allocation2] sm:$0xff] (!%p608_p7), %vm303_vm0, %v946_v0 }
  0x6e   : > { %306 = vst.msk [vmem:[#allocation3] sm:$0xff] (!%p608_p7), %vm305_vm1, %v946_v0  ;;  %307 = vst.msk [vmem:[#allocation4] sm:$0xff] (!%p608_p7), %vm305_vm1, %v946_v0 }
  0x74 PF: > { %v309_v1 = vld [vmem:[%s266_s6] sm:$0xff]  ;;  %v308_v2 = vld [vmem:[%s257_s11] sm:$0xff]  ;;  %v947_v3 = vmov 0.0   ;;  %vm948_vm2 = vmmov 0   ;;  %vm315_vm3 = vcmask 7168   ;;  %vm367_vm4 = vcmask 64512  }
  0x75   : > { %620 = vmatprep.subr.bf16.mxu0 %v947_v3  ;;  %v325_v4 = vpack.c.bf16 %v309_v1, %v309_v1  ;;  %622 = vmatprep.mubr.msk.bf16.mxu0 %vm948_vm2, %v947_v3  ;;  %v311_v5 = vmul.f32 %v308_v2, %v308_v2  ;;  %v318_v6 = vmul.f32 %v309_v1, %v309_v1  ;;  %v310_v8 = vld [vmem:[#allocation3] sm:$0xff]  ;;  %v317_v11 = vld [vmem:[#allocation4] sm:$0xff]  ;;  %v323_v14 = vld [vmem:[#allocation2] sm:$0xff]  ;;  %p609_p4 = scmp.ne.s32.totalorder %s926_s24, 1 }
  0x76   : > { %v324_v7 = vpack.c.bf16 %v308_v2, %v308_v2  ;;  %v949_v22 = vmov (!%p609_p4), 0   ;;  %v950_v25 = vmov (!%p609_p4), 0.0   ;;  %v400_v26 = vld [vmem:[%s1272_s2] sm:$0xff] (!%p609_p4)  ;;  %v379_v30 = vlaneseq (!%p609_p4) }
  0x77   : > { %621 = vmatpush3.bf16.xpose.msra.mxu0 %v325_v4  ;;  %312 = vadd.xlane.f32.xlu0 %v311_v5  ;;  %v409_v46 = vld [vmem:[%s1273_s3] sm:$0xff] (!%p609_p4)  ;;  %vm951_vm6 = vmmov (!%p609_p4), 0   ;;  %vm428_vm7 = vcmask (!%p609_p4), 1043456  }
  0x78   : > { %746 = vset.pattern.permute.xlu0 (!%p609_p4), %v949_v22  ;;  %626 = vmatprep.subr.bf16.mxu0 (!%p609_p4), %v950_v25  ;;  %v380_v31 = vshrl.u32 (!%p609_p4), %v379_v30, 7  ;;  %v382_v32 = vand.u32 (!%p609_p4), 127, %v379_v30  ;;  %v422_v58 = vld [vmem:[%s1274_s4] sm:$0xff] (!%p609_p4) }
  0x79   : > { %v423_v61 = vpack.c.bf16 (!%p609_p4), %v422_v58, %v422_v58 }
  0x7a   : > { %vm383_vm5 = vcmp.eq.s32.totalorder (!%p609_p4), %v380_v31, %v382_v32 }
  0x7b   : > { %319 = vadd.xlane.f32.xlu0 %v318_v6  ;;  %v610_v33 = vsel (!%p609_p4), %vm383_vm5, 1.0, %v950_v25 }
  0x7e   : > { %623 = vmatmul.mubr.bf16.vlgmr.msra.gmra.mrb[0].mxu0 %v324_v7 }
  0x7f   : > { %628 = vmatprep.mubr.msk.bf16.mxu0 (!%p609_p4), %vm951_vm6, %v950_v25 }
 0x104   : > { %v313_v9 = vpop.xlane.xlu0 %312 }
 0x105   : > { %v314_v10 = vadd.f32 %v313_v9, %v310_v8 }
 0x107   : > { %316 = vst.msk [vmem:[#allocation3] sm:$0xff] %vm315_vm3, %v314_v10 }
 0x108   : > { %v320_v12 = vpop.xlane.xlu0 %319 }
 0x109   : > { %v321_v13 = vadd.f32 %v320_v12, %v317_v11 }
 0x10b   : > { %322 = vst.msk [vmem:[#allocation4] sm:$0xff] %vm315_vm3, %v321_v13 }
 0x10e   : > { %v373_v21 = vld [vmem:[#allocation3] sm:$0xff] (!%p609_p4) }
 0x10f   : > { %v374_v24 = vmax.f32 (!%p609_p4), %v373_v21, 1e-24 }
 0x112   : > { %v376_v20 = vld [vmem:[#allocation4] sm:$0xff] (!%p609_p4) }
 0x113   : > { %v377_v23 = vmax.f32 (!%p609_p4), %v376_v20, 1e-24 }
 0x115   : > { %747 = vrsqrt.f32 (!%p609_p4), %v377_v23 }
 0x116   : > { %749 = vrsqrt.f32 (!%p609_p4), %v374_v24 }
 0x11f   : > { %v748_v27 = vpop.eup (!%p609_p4), %747 }
 0x120   : > { %v750_v28 = vpop.eup (!%p609_p4), %749  ;;  %388 = vperm.xlu0 (!%p609_p4), %746, %v748_v27  }
 0x121   : > { %v401_v29 = vmul.f32 (!%p609_p4), %v750_v28, %v400_v26 }
 0x124   : > { %404 = vperm.xlu0 (!%p609_p4), %746, %v401_v29  }
 0x14e   : > { %372 = sbr.rel (%p609_p4) target bundleno = 970 (0x3ca), region = 56 }
 0x151   : > { %v360_v15 = vpop.f32.mrb[0].mxu0 }
 0x152   : > { %v366_v16 = vadd.f32 %v360_v15, %v323_v14  ;;  %v624_v17 = vpop.f32.mrb[1].mxu0 }
 0x153   : > { %v363_v18 = vpop.f32.mrb[2].mxu0 }
 0x154   : > { %368 = vst.msk [vmem:[#allocation2] sm:$0xff] %vm367_vm4, %v366_v16  ;;  %v625_v19 = vpop.f32.mrb[3].mxu0 }
 0x15b   : > { %v399_v41 = vld [vmem:[#allocation2] sm:$0xff] }
 0x19f   : > { %v389_v34 = vpop.permute.xlu0 %388 }
 0x1a0   : > { %v391_v35 = vmul.f32 %v610_v33, %v389_v34 }
 0x1a2   : > { %v392_v36 = vsel %vm367_vm4, %v391_v35, 0.0 }
 0x1a3   : > { %v393_v37 = vrot.slane %v392_v36, 4  ;;  %v405_v42 = vpop.permute.xlu0 %404 }
 0x1a4   : > { %v407_v45 = vmul.f32 %v405_v42, %v399_v41 }
 0x1a5   : > { %v394_v38 = vadd.f32 %v393_v37, %v392_v36 }
 0x1a7   : > { %v395_v39 = vrot.slane %v394_v38, 2 }
 0x1a9   : > { %v396_v40 = vadd.f32 %v395_v39, %v394_v38 }
 0x1ab   : > { %v397_v43 = vrot.slane %v396_v40, 1 }
 0x1ad   : > { %v398_v44 = vadd.f32 %v397_v43, %v396_v40 }
 0x1af   : > { %v408_v47 = vmul.f32 %v407_v45, %v398_v44 }
 0x1b1   : > { %v410_v48 = vadd.f32 %v409_v46, %v408_v47 }
 0x1b3   : > { %v411_v49 = vsel %vm367_vm4, %v410_v48, -inf }
 0x1b4   : > { %412 = vmax.xlane.f32.xlu1 %v411_v49 }
 0x241   : > { %v413_v50 = vpop.xlane.xlu1 %412 }
 0x242   : > { %v414_v51 = vsub.f32 %v410_v48, %v413_v50 }
 0x244   : > { %v415_v52 = vmul.f32 1.442695, %v414_v51 }
 0x246   : > { %751 = vpow2.f32 %v415_v52 }
 0x250   : > { %v752_v53 = vpop.eup %751 }
 0x251   : > { %v417_v54 = vsel %vm367_vm4, %v752_v53, 0.0 }
 0x252   : > { %418 = vadd.xlane.f32.xlu1 %v417_v54 }
 0x2df   : > { %v419_v55 = vpop.xlane.xlu1 %418 }
 0x2e0   : > { %753 = vrcp.f32 %v419_v55 }
 0x2ea   : > { %v754_v56 = vpop.eup %753 }
 0x2eb   : > { %v421_v57 = vmul.f32 %v754_v56, %v752_v53 }
 0x2ed   : > { %v424_v59 = vpack.c.bf16 %v421_v57, %v421_v57 }
 0x2ef   : > { %v430_v60 = vsel %vm428_vm7, %v424_v59, 0 }
 0x2f0   : > { %627 = vmatpush3.bf16.msra.mxu0 %v430_v60 }
 0x2f3   : > { %629 = vmatmul.mubr.msk.bf16.vlgmr.msra.gmra.mrb[0].mxu0 %vm367_vm4, %v423_v61 }
 0x3c6   : > { %v466_v62 = vpop.f32.mrb[0].mxu0 }
 0x3c7   : > { %472 = vst.msk [vmem:[%s297_s26] sm:$0xff] %vm367_vm4, %v466_v62  ;;  %v630_v63 = vpop.f32.mrb[1].mxu0 }
 0x3c8   : > { %v469_v0 = vpop.f32.mrb[2].mxu0 }
 0x3c9   : > { %v631_v1 = vpop.f32.mrb[3].mxu0 }
 0x3ca PF: > { %s613_s17 = sshll.u32 %s930_s25, 7  ;;  %s487_s10 = sshll.u32 %s297_s26, 4  ;;  %s488_s10 = int_to_ptr.vmem [resolvable:$true] %s487_s10 }
 0x3cb   : > { %s1210_s30 = scalar_lea.hbm %s1275_s5, %s613_s17  ;;  %s474_s11 = scalar_lea.sflag [#allocation7], %s295_s23 }
 0x3cc   : > { %s816_s27 = scalar_lea.vmem %s488_s10, 128  ;;  %p1304_p10 = scmp.ne.s32.totalorder %s1293_s15, 0 }
 0x3cd   : > { %p817_p2 = scmp.ne.s32.totalorder %s488_s10, %s816_s27  ;;  %s952_s6 = smov [#allocation10]  }
 0x3ce   : > { %s820_s12 = sshll.u32 %s952_s6, 4  ;;  %s821_s12 = int_to_ptr.vmem [resolvable:$false] %s820_s12 }
 0x3cf   : > { %p818_p11 = pnand %p817_p2, %p1304_p10  ;;  %s822_s13 = scalar_lea.vmem %s821_s12, 256 }
 0x3d0   : > { %p823_p3 = scmp.lt.s32.totalorder %s488_s10, %s821_s12  ;;  %p824_p12 = scmp.lt.s32.totalorder %s822_s13, %s816_s27 }
 0x3d1   : > { %p819_p13 = pneg %p818_p11 }
 0x3d2   : > { %p825_p9 = por %p824_p12, %p823_p3 }
 0x3d4   : > { %p826_p0 = pnand %p825_p9, %p819_p13 }
 0x3d6   : > { %829 = shalt.err (!%p826_p0)
}
 0x3d7   : > { %s830_s25 = scalar_lea.hbm %s1210_s30, 128  ;;  %s834_s26 = scalar_lea.hbm %s1275_s5, 256 }
 0x3d8   : > { %p831_p5 = scmp.ne.s32.totalorder %s1210_s30, %s830_s25  ;;  %p835_p6 = scmp.lt.u32.totalorder %s1210_s30, %s1275_s5 }
 0x3d9   : > { %p836_p7 = scmp.lt.u32.totalorder %s834_s26, %s830_s25  ;;  %p838_p2 = scmp.lt.u32.totalorder %s830_s25, %s1210_s30 }
 0x3da   : > { %p832_p8 = pnand %p831_p5, %p1304_p10 }
 0x3db   : > { %p837_p4 = por %p836_p7, %p835_p6 }
 0x3dc   : > { %p833_p1 = pneg %p832_p8 }
 0x3dd   : > { %p839_p11 = por %p838_p2, %p837_p4 }
 0x3df   : > { %p840_p13 = pnand %p839_p11, %p833_p1 }
 0x3e1   : > { %843 = shalt.err (!%p840_p13)
}
 0x3e2   : > { %637 = dma.vmem_to_hbm [thread:$0]  (%p1304_p10), %s488_s10, 128, %s1210_s30, %s474_s11  }
 0x3e3 PF: > { %p651_p3 = scmp.ge.s32.totalorder %s942_s28, 2  ;;  %s499_s0 = sand.u32 1, %s902_s18  }
 0x3e4   : > { %p1305_p12 = scmp.ne.s32.totalorder %s1295_s21, 0  ;;  %s500_s29 = scalar_lea.sflag [#allocation7], %s499_s0 }
 0x3e6   : > { %p647_p9 = pnand %p651_p3, %p1305_p12 }
 0x3e8   : > { %897 = dma.done.wait (!%p647_p9), %s500_s29, 128  }
 0x3e9   : > { %899 = vsyncadd (!%p647_p9), %s500_s29, 4294967168  ;;  %s24_s28 = sadd.s32 1, %s942_s28   ;;  %s1306_s15 = sld [smem:[#allocation14_spill]] }
 0x3ea   : > { %p21_p0 = scmp.ge.s32.totalorder %s24_s28, 6   ;;  %s1307_s23 = sld [smem:[#allocation19_spill]] }
 0x3eb   : > { %s1308_s24 = sld [smem:[#allocation15_spill]]  ;;  %s1309_s25 = sld [smem:[#allocation16_spill]] }
 0x3ec   : > { %s1310_s26 = sld [smem:[#allocation17_spill]]  ;;  %s1311_s27 = sld [smem:[#allocation18_spill]] }
 0x3ed   : > { %s1312_s18 = smov %s906_s19  ;;  %s1313_s19 = smov %s910_s20 }
 0x3ee   : > { %s1314_s20 = smov %s1070_s16  ;;  %s1315_s21 = smov %s918_s22 }
 0x3ef   : > { %s1316_s22 = smov %s1306_s15  ;;  %23 = sbr.rel (!%p21_p0) target bundleno = 13 (0xd), region = 106 }
 0x3f6   :  { %505 = vsyncpa [#allocation6], 1 }
 0x3f7   :  { %507 = vsyncpa [#allocation6 + $0x1], 1 }
 0x3f8   :  { %508 = vsyncpa [#allocation9], 1 }
 0x3f9   :  { %510 = vsyncpa [#allocation9 + $0x1], 1 }
 0x3fa   :  { %511 = vsyncpa [#allocation7], 1 }
 0x3fb   :  { %513 = vsyncpa [#allocation7 + $0x1], 1 }

</bundles_post_ra>
